<compile_context>
chip_gen: v7x
topology: tpu7x:2x2x1
jax: 0.10.0
libtpu: 0.0.40
codegen_flags: <defaults>
</compile_context>

<pallas_src>
import functools

import jax
import jax.numpy as jnp
from jax import lax
from jax.experimental import pallas as pl
from jax.experimental.pallas import tpu as pltpu

LANE = 128
SUBLANE = 8


def _round_up(x, m):
    return (x + m - 1) // m * m


def _fcc_kernel(*refs, num_stages, hidden, batch, use_bn, use_bias, eps,
                negative_slope):
    """Fused FCCActivationNormNetwork forward.

    Ref order:
      x        (Bp, F0)            bf16  VMEM (auto-DMA)
      w0       (F0, hidden)        bf16  VMEM (auto-DMA), unpadded
      misc     (rows, LANEW)       f32   VMEM (auto-DMA)   [present iff use_bn or use_bias]
                 rows: gamma_0..gamma_{n-1}, beta_0..beta_{n-1} (iff use_bn), bias (iff use_bias)
      w_rest   (n*hidden, LANEW)   bf16  HBM (pl.ANY): W_1..W_{n-1}, W_pred stacked
      out      (Bp, LANEW)         f32   VMEM
      w_vmem   (n*hidden, LANEW)   bf16  VMEM scratch (manual prefetch destination)
      sem      DMA semaphore
    """
    idx = 0
    x_ref = refs[idx]; idx += 1
    w0_ref = refs[idx]; idx += 1
    misc_ref = None
    if use_bn or use_bias:
        misc_ref = refs[idx]; idx += 1
    w_rest_hbm = refs[idx]; idx += 1
    out_ref = refs[idx]; idx += 1
    w_vmem = refs[idx]; idx += 1
    sem = refs[idx]

    # Start fetching the later-stage / prediction weights now; the DMA overlaps the
    # dominant stage-0 contraction below (grid=() has no automatic pipelining).
    rest_copy = pltpu.make_async_copy(w_rest_hbm, w_vmem, sem)
    rest_copy.start()

    bpad = x_ref.shape[0]
    inv_b = 1.0 / float(batch)

    if use_bn:
        # Hoisted once: padded batch rows must not contribute to batch statistics.
        row_mask = (lax.broadcasted_iota(jnp.int32, (bpad, hidden), 0)
                    < batch).astype(jnp.float32)

    def bn_leaky(h, stage):
        if use_bn:
            gamma = misc_ref[stage:stage + 1, :hidden]                         # (1, hidden)
            beta = misc_ref[num_stages + stage:num_stages + stage + 1, :hidden]
            hm = h * row_mask
            mean = jnp.sum(hm, axis=0, keepdims=True) * inv_b
            ex2 = jnp.sum(hm * h, axis=0, keepdims=True) * inv_b
            var = ex2 - mean * mean                       # biased var, as F.batch_norm
            h = (h - mean) * lax.rsqrt(var + eps) * gamma + beta
        return jnp.where(h >= 0, h, h * negative_slope)   # F.leaky_relu default 0.01

    # Stage 0: bf16 x bf16 -> f32 accumulation on the MXU (the only large contraction).
    h = jnp.dot(x_ref[...], w0_ref[...], preferred_element_type=jnp.float32)
    h = bn_leaky(h, 0)

    rest_copy.wait()

    # Hidden stages 1..n-1: tiny 40x40 contractions kept in f32 so the intermediate
    # activations are never re-quantized (weights were bf16-rounded once at init).
    for i in range(1, num_stages):
        w = w_vmem[(i - 1) * hidden:i * hidden, :hidden].astype(jnp.float32)
        h = jnp.dot(h, w, preferred_element_type=jnp.float32)
        h = bn_leaky(h, i)

    # Prediction layer: lane-dense (hidden, LANEW) weight -> unmasked full-width store.
    wp = w_vmem[(num_stages - 1) * hidden:num_stages * hidden, :].astype(jnp.float32)
    logits = jnp.dot(h, wp, preferred_element_type=jnp.float32)
    if use_bias:
        bias_row = 2 * num_stages if use_bn else 0
        logits = logits + misc_ref[bias_row:bias_row + 1, :]
    out_ref[...] = logits.astype(out_ref.dtype)


def prepare_params(stage_weights, bn_gammas, bn_betas, pred_weight, pred_bias,
                   *, use_bn=True, param_dtype=jnp.bfloat16):
    """One-time packing of the module parameters (kept OFF the per-call hot path).

    stage_weights[i]: (hidden, fan_in_i) MetaLinearLayer weights (no bias)
    bn_gammas/bn_betas: lists of (hidden,) BN affine params (used iff use_bn)
    pred_weight: (num_classes, hidden); pred_bias: (num_classes,) or None
    """
    num_stages = len(stage_weights)
    hidden = stage_weights[0].shape[0]
    num_classes = pred_weight.shape[0]
    use_bias = pred_bias is not None
    lane_w = max(_round_up(num_classes, LANE), _round_up(hidden, LANE))

    # W_0 stays unpadded (it is the big one: fan_in x hidden); only transpose + cast.
    w0 = jnp.asarray(stage_weights[0]).T.astype(param_dtype)

    # W_1..W_{n-1} and W_pred stacked into one lane-dense bf16 slab -> a single DMA.
    w_rest = jnp.zeros((num_stages * hidden, lane_w), param_dtype)
    for i in range(1, num_stages):
        w_rest = w_rest.at[(i - 1) * hidden:i * hidden, :hidden].set(
            jnp.asarray(stage_weights[i]).T.astype(param_dtype))
    w_rest = w_rest.at[(num_stages - 1) * hidden:, :num_classes].set(
        jnp.asarray(pred_weight).T.astype(param_dtype))

    # BN affine params + prediction bias in one small f32 slab (BN math stays f32).
    misc = None
    if use_bn or use_bias:
        rows = (2 * num_stages if use_bn else 0) + (1 if use_bias else 0)
        misc = jnp.zeros((rows, lane_w), jnp.float32)
        if use_bn:
            for i in range(num_stages):
                misc = misc.at[i, :hidden].set(jnp.asarray(bn_gammas[i], jnp.float32))
                misc = misc.at[num_stages + i, :hidden].set(
                    jnp.asarray(bn_betas[i], jnp.float32))
        if use_bias:
            misc = misc.at[rows - 1, :num_classes].set(
                jnp.asarray(pred_bias, jnp.float32))

    return dict(w0=w0, w_rest=w_rest, misc=misc, num_stages=num_stages,
                hidden=hidden, num_classes=num_classes, lane_w=lane_w,
                use_bn=use_bn, use_bias=use_bias)


def fcc_activation_norm_forward(x, params, *, eps=1e-5, negative_slope=0.01):
    """Hot-path forward. `params` comes from prepare_params (packed once at init);
    the only per-call host-side work is flatten + cast + pad-batch-to-8 of x
    (these fuse into one tiny op under jit)."""
    b = x.shape[0]
    xf = x.reshape(b, -1).astype(params["w0"].dtype)
    bpad = _round_up(b, SUBLANE)
    if bpad != b:
        xf = jnp.pad(xf, ((0, bpad - b), (0, 0)))

    num_stages = params["num_stages"]
    hidden = params["hidden"]
    lane_w = params["lane_w"]
    use_bn = params["use_bn"]
    use_bias = params["use_bias"]

    inputs = [xf, params["w0"]]
    in_specs = [pl.BlockSpec(memory_space=pltpu.MemorySpace.VMEM),
                pl.BlockSpec(memory_space=pltpu.MemorySpace.VMEM)]
    if params["misc"] is not None:
        inputs.append(params["misc"])
        in_specs.append(pl.BlockSpec(memory_space=pltpu.MemorySpace.VMEM))
    inputs.append(params["w_rest"])
    in_specs.append(pl.BlockSpec(memory_space=pl.ANY))  # stays in HBM; prefetched in-kernel

    kernel = functools.partial(
        _fcc_kernel, num_stages=num_stages, hidden=hidden, batch=b,
        use_bn=use_bn, use_bias=use_bias, eps=eps, negative_slope=negative_slope)

    out = pl.pallas_call(
        kernel,
        out_shape=jax.ShapeDtypeStruct((bpad, lane_w), jnp.float32),
        in_specs=in_specs,
        out_specs=pl.BlockSpec(memory_space=pltpu.MemorySpace.VMEM),
        scratch_shapes=[
            pltpu.VMEM(params["w_rest"].shape, params["w_rest"].dtype),
            pltpu.SemaphoreType.DMA,
        ],
        compiler_params=pltpu.CompilerParams(vmem_limit_bytes=32 * 1024 * 1024),
    )(*inputs)

    return out[:b, :params["num_classes"]]


def init_params(key, input_features, hidden, num_stages, num_classes,
                use_bn=True, use_bias=True, dtype=jnp.float32):
    """Mirrors MetaLinearLayer (xavier_uniform_, zero bias default) / MetaBatchNormLayer
    init (BN affine randomized slightly so the affine path is actually exercised)."""
    keys = jax.random.split(key, num_stages * 3 + 2)
    stage_weights, gammas, betas = [], [], []
    fan_in = input_features
    ki = 0
    for _ in range(num_stages):
        bound = (6.0 / (fan_in + hidden)) ** 0.5
        stage_weights.append(jax.random.uniform(
            keys[ki], (hidden, fan_in), minval=-bound, maxval=bound, dtype=dtype))
        ki += 1
        if use_bn:
            gammas.append(1.0 + 0.1 * jax.random.normal(keys[ki], (hidden,), dtype))
            ki += 1
            betas.append(0.1 * jax.random.normal(keys[ki], (hidden,), dtype))
            ki += 1
        else:
            ki += 2
        fan_in = hidden
    bound = (6.0 / (fan_in + num_classes)) ** 0.5
    wp = jax.random.uniform(keys[ki], (num_classes, fan_in),
                            minval=-bound, maxval=bound, dtype=dtype)
    ki += 1
    bias = (0.1 * jax.random.normal(keys[ki], (num_classes,), dtype)
            if use_bias else None)
    return stage_weights, gammas, betas, wp, bias


def reference_forward(x, stage_weights, gammas, betas, wp, bias, use_bn,
                      eps=1e-5, neg=0.01):
    """Pure-JAX f32 reference matching the PyTorch forward (F.batch_norm training=True)."""
    hi = jax.lax.Precision.HIGHEST
    out = x.reshape(x.shape[0], -1).astype(jnp.float32)
    for i, w in enumerate(stage_weights):
        out = jnp.dot(out, w.T.astype(jnp.float32), precision=hi)
        if use_bn:
            mean = jnp.mean(out, axis=0, keepdims=True)
            var = jnp.mean((out - mean) ** 2, axis=0, keepdims=True)
            out = (out - mean) / jnp.sqrt(var + eps) * gammas[i] + betas[i]
        out = jnp.where(out >= 0, out, neg * out)
    out = jnp.dot(out, wp.T.astype(jnp.float32), precision=hi)
    if bias is not None:
        out = out + bias
    return out


if __name__ == "__main__":
    # im_shape = (2, 4, 16, 16) -> flattened features = 1024
    batch, channels, height, width = 2, 4, 16, 16
    num_stages = 3
    hidden = 40            # num_filters hardcoded in the module's build_network
    num_classes = 5
    use_bn = True          # "ActivationNorm"
    use_bias = True        # preds_linear bias

    key = jax.random.PRNGKey(0)
    kx, kp = jax.random.split(key)
    x = jax.random.normal(kx, (batch, channels, height, width), dtype=jnp.float32)

    sw, g, be, wp, bias = init_params(kp, channels * height * width, hidden,
                                      num_stages, num_classes, use_bn, use_bias)

    params = prepare_params(sw, g, be, wp, bias, use_bn=use_bn)   # once, off the hot path

    out = fcc_activation_norm_forward(x, params)
    out = jax.block_until_ready(out)
    assert out.shape == (batch, num_classes)

    # f32 reference over the SAME bf16-stored parameter / input values.
    q = lambda a: a.astype(jnp.bfloat16).astype(jnp.float32)
    ref = reference_forward(q(x), [q(w) for w in sw], g, be, q(wp), bias, use_bn)
    max_diff = float(jnp.max(jnp.abs(out - ref)))
    assert jnp.allclose(out, ref, atol=1e-2, rtol=1e-2), f"max abs diff {max_diff}"

    print("KERNEL_OK")
</pallas_src>

<mosaic_0001>
module attributes {stable_mosaic.version = 11 : i64} {
  func.func @_fcc_kernel(%arg0: memref<8x1024xbf16, #tpu.memory_space<vmem>>, %arg1: memref<1024x40xbf16, #tpu.memory_space<vmem>>, %arg2: memref<7x128xf32, #tpu.memory_space<vmem>>, %arg3: memref<120x128xbf16, #tpu.memory_space<any>>, %arg4: memref<8x128xf32, #tpu.memory_space<vmem>>, %arg5: memref<120x128xbf16, #tpu.memory_space<vmem>>, %arg6: memref<!tpu.dma_semaphore, #tpu.memory_space<semaphore_mem>>) attributes {dimension_semantics = [], scalar_prefetch = 0 : i64, scratch_operands = 2 : i64, tpu.core_type = #tpu.core_type<tc>} {
    tpu.enqueue_dma source(%arg3 : memref<120x128xbf16, #tpu.memory_space<any>>) target(%arg5 : memref<120x128xbf16, #tpu.memory_space<vmem>>) target_semaphore(%arg6 : memref<!tpu.dma_semaphore, #tpu.memory_space<semaphore_mem>>)
    %0 = tpu.iota {dimensions = array<i32: 0>} : vector<8x40xi32>
    %c2_i32 = arith.constant 2 : i32
    %1 = vector.broadcast %c2_i32 : i32 to vector<8x40xi32>
    %2 = arith.cmpi slt, %0, %1 : vector<8x40xi32>
    %3 = arith.extui %2 : vector<8x40xi1> to vector<8x40xi32>
    %4 = arith.sitofp %3 : vector<8x40xi32> to vector<8x40xf32>
    %c0 = arith.constant 0 : index
    %c0_0 = arith.constant 0 : index
    %5 = vector.load %arg0[%c0, %c0_0] : memref<8x1024xbf16, #tpu.memory_space<vmem>>, vector<8x1024xbf16>
    %c0_1 = arith.constant 0 : index
    %c0_2 = arith.constant 0 : index
    %6 = vector.load %arg1[%c0_1, %c0_2] : memref<1024x40xbf16, #tpu.memory_space<vmem>>, vector<1024x40xbf16>
    %cst = arith.constant dense<0.000000e+00> : vector<8x40xf32>
    %7 = tpu.matmul %5, %6, %cst {dimension_numbers = #tpu.dot_dimension_numbers<[1], [0], [0], [1], [0, 0, 1, 1], [], []>} : vector<8x1024xbf16>, vector<1024x40xbf16>, vector<8x40xf32> -> vector<8x40xf32>
    %c0_3 = arith.constant 0 : index
    %c0_4 = arith.constant 0 : index
    %8 = vector.load %arg2[%c0_3, %c0_4] : memref<7x128xf32, #tpu.memory_space<vmem>>, vector<1x40xf32>
    %c3 = arith.constant 3 : index
    %c0_5 = arith.constant 0 : index
    %9 = vector.load %arg2[%c3, %c0_5] : memref<7x128xf32, #tpu.memory_space<vmem>>, vector<1x40xf32>
    %10 = arith.mulf %7, %4 : vector<8x40xf32>
    %cst_6 = arith.constant dense<0.000000e+00> : vector<40xf32>
    %11 = vector.multi_reduction <add>, %10, %cst_6 [0] : vector<8x40xf32> to vector<40xf32>
    %12 = vector.shape_cast %11 : vector<40xf32> to vector<1x40xf32>
    %cst_7 = arith.constant 5.000000e-01 : f32
    %13 = vector.broadcast %cst_7 : f32 to vector<1x40xf32>
    %14 = arith.mulf %12, %13 : vector<1x40xf32>
    %15 = arith.mulf %10, %7 : vector<8x40xf32>
    %cst_8 = arith.constant dense<0.000000e+00> : vector<40xf32>
    %16 = vector.multi_reduction <add>, %15, %cst_8 [0] : vector<8x40xf32> to vector<40xf32>
    %17 = vector.shape_cast %16 : vector<40xf32> to vector<1x40xf32>
    %cst_9 = arith.constant 5.000000e-01 : f32
    %18 = vector.broadcast %cst_9 : f32 to vector<1x40xf32>
    %19 = arith.mulf %17, %18 : vector<1x40xf32>
    %20 = arith.mulf %14, %14 : vector<1x40xf32>
    %21 = arith.subf %19, %20 : vector<1x40xf32>
    %22 = vector.broadcast %14 : vector<1x40xf32> to vector<8x40xf32>
    %23 = arith.subf %7, %22 : vector<8x40xf32>
    %cst_10 = arith.constant 9.99999974E-6 : f32
    %24 = vector.broadcast %cst_10 : f32 to vector<1x40xf32>
    %25 = arith.addf %21, %24 : vector<1x40xf32>
    %26 = math.rsqrt %25 : vector<1x40xf32>
    %27 = vector.broadcast %26 : vector<1x40xf32> to vector<8x40xf32>
    %28 = arith.mulf %23, %27 : vector<8x40xf32>
    %29 = vector.broadcast %8 : vector<1x40xf32> to vector<8x40xf32>
    %30 = arith.mulf %28, %29 : vector<8x40xf32>
    %31 = vector.broadcast %9 : vector<1x40xf32> to vector<8x40xf32>
    %32 = arith.addf %30, %31 : vector<8x40xf32>
    %cst_11 = arith.constant 0.000000e+00 : f32
    %33 = vector.broadcast %cst_11 : f32 to vector<8x40xf32>
    %34 = arith.cmpf oge, %32, %33 : vector<8x40xf32>
    %cst_12 = arith.constant 0.00999999977 : f32
    %35 = vector.broadcast %cst_12 : f32 to vector<8x40xf32>
    %36 = arith.mulf %32, %35 : vector<8x40xf32>
    %37 = arith.select %34, %32, %36 : vector<8x40xi1>, vector<8x40xf32>
    tpu.wait_dma2 semaphore(%arg6 : memref<!tpu.dma_semaphore, #tpu.memory_space<semaphore_mem>>) src(%arg3 : memref<120x128xbf16, #tpu.memory_space<any>>) dst(%arg5 : memref<120x128xbf16, #tpu.memory_space<vmem>>)
    %c0_13 = arith.constant 0 : index
    %c0_14 = arith.constant 0 : index
    %38 = vector.load %arg5[%c0_13, %c0_14] : memref<120x128xbf16, #tpu.memory_space<vmem>>, vector<40x40xbf16>
    %39 = arith.extf %38 : vector<40x40xbf16> to vector<40x40xf32>
    %cst_15 = arith.constant dense<0.000000e+00> : vector<8x40xf32>
    %40 = tpu.matmul %37, %39, %cst_15 {dimension_numbers = #tpu.dot_dimension_numbers<[1], [0], [0], [1], [0, 0, 1, 1], [], []>} : vector<8x40xf32>, vector<40x40xf32>, vector<8x40xf32> -> vector<8x40xf32>
    %c1 = arith.constant 1 : index
    %c0_16 = arith.constant 0 : index
    %41 = vector.load %arg2[%c1, %c0_16] : memref<7x128xf32, #tpu.memory_space<vmem>>, vector<1x40xf32>
    %c4 = arith.constant 4 : index
    %c0_17 = arith.constant 0 : index
    %42 = vector.load %arg2[%c4, %c0_17] : memref<7x128xf32, #tpu.memory_space<vmem>>, vector<1x40xf32>
    %43 = arith.mulf %40, %4 : vector<8x40xf32>
    %cst_18 = arith.constant dense<0.000000e+00> : vector<40xf32>
    %44 = vector.multi_reduction <add>, %43, %cst_18 [0] : vector<8x40xf32> to vector<40xf32>
    %45 = vector.shape_cast %44 : vector<40xf32> to vector<1x40xf32>
    %cst_19 = arith.constant 5.000000e-01 : f32
    %46 = vector.broadcast %cst_19 : f32 to vector<1x40xf32>
    %47 = arith.mulf %45, %46 : vector<1x40xf32>
    %48 = arith.mulf %43, %40 : vector<8x40xf32>
    %cst_20 = arith.constant dense<0.000000e+00> : vector<40xf32>
    %49 = vector.multi_reduction <add>, %48, %cst_20 [0] : vector<8x40xf32> to vector<40xf32>
    %50 = vector.shape_cast %49 : vector<40xf32> to vector<1x40xf32>
    %cst_21 = arith.constant 5.000000e-01 : f32
    %51 = vector.broadcast %cst_21 : f32 to vector<1x40xf32>
    %52 = arith.mulf %50, %51 : vector<1x40xf32>
    %53 = arith.mulf %47, %47 : vector<1x40xf32>
    %54 = arith.subf %52, %53 : vector<1x40xf32>
    %55 = vector.broadcast %47 : vector<1x40xf32> to vector<8x40xf32>
    %56 = arith.subf %40, %55 : vector<8x40xf32>
    %cst_22 = arith.constant 9.99999974E-6 : f32
    %57 = vector.broadcast %cst_22 : f32 to vector<1x40xf32>
    %58 = arith.addf %54, %57 : vector<1x40xf32>
    %59 = math.rsqrt %58 : vector<1x40xf32>
    %60 = vector.broadcast %59 : vector<1x40xf32> to vector<8x40xf32>
    %61 = arith.mulf %56, %60 : vector<8x40xf32>
    %62 = vector.broadcast %41 : vector<1x40xf32> to vector<8x40xf32>
    %63 = arith.mulf %61, %62 : vector<8x40xf32>
    %64 = vector.broadcast %42 : vector<1x40xf32> to vector<8x40xf32>
    %65 = arith.addf %63, %64 : vector<8x40xf32>
    %cst_23 = arith.constant 0.000000e+00 : f32
    %66 = vector.broadcast %cst_23 : f32 to vector<8x40xf32>
    %67 = arith.cmpf oge, %65, %66 : vector<8x40xf32>
    %cst_24 = arith.constant 0.00999999977 : f32
    %68 = vector.broadcast %cst_24 : f32 to vector<8x40xf32>
    %69 = arith.mulf %65, %68 : vector<8x40xf32>
    %70 = arith.select %67, %65, %69 : vector<8x40xi1>, vector<8x40xf32>
    %c40 = arith.constant 40 : index
    %c0_25 = arith.constant 0 : index
    %71 = vector.load %arg5[%c40, %c0_25] : memref<120x128xbf16, #tpu.memory_space<vmem>>, vector<40x40xbf16>
    %72 = arith.extf %71 : vector<40x40xbf16> to vector<40x40xf32>
    %cst_26 = arith.constant dense<0.000000e+00> : vector<8x40xf32>
    %73 = tpu.matmul %70, %72, %cst_26 {dimension_numbers = #tpu.dot_dimension_numbers<[1], [0], [0], [1], [0, 0, 1, 1], [], []>} : vector<8x40xf32>, vector<40x40xf32>, vector<8x40xf32> -> vector<8x40xf32>
    %c2 = arith.constant 2 : index
    %c0_27 = arith.constant 0 : index
    %74 = vector.load %arg2[%c2, %c0_27] : memref<7x128xf32, #tpu.memory_space<vmem>>, vector<1x40xf32>
    %c5 = arith.constant 5 : index
    %c0_28 = arith.constant 0 : index
    %75 = vector.load %arg2[%c5, %c0_28] : memref<7x128xf32, #tpu.memory_space<vmem>>, vector<1x40xf32>
    %76 = arith.mulf %73, %4 : vector<8x40xf32>
    %cst_29 = arith.constant dense<0.000000e+00> : vector<40xf32>
    %77 = vector.multi_reduction <add>, %76, %cst_29 [0] : vector<8x40xf32> to vector<40xf32>
    %78 = vector.shape_cast %77 : vector<40xf32> to vector<1x40xf32>
    %cst_30 = arith.constant 5.000000e-01 : f32
    %79 = vector.broadcast %cst_30 : f32 to vector<1x40xf32>
    %80 = arith.mulf %78, %79 : vector<1x40xf32>
    %81 = arith.mulf %76, %73 : vector<8x40xf32>
    %cst_31 = arith.constant dense<0.000000e+00> : vector<40xf32>
    %82 = vector.multi_reduction <add>, %81, %cst_31 [0] : vector<8x40xf32> to vector<40xf32>
    %83 = vector.shape_cast %82 : vector<40xf32> to vector<1x40xf32>
    %cst_32 = arith.constant 5.000000e-01 : f32
    %84 = vector.broadcast %cst_32 : f32 to vector<1x40xf32>
    %85 = arith.mulf %83, %84 : vector<1x40xf32>
    %86 = arith.mulf %80, %80 : vector<1x40xf32>
    %87 = arith.subf %85, %86 : vector<1x40xf32>
    %88 = vector.broadcast %80 : vector<1x40xf32> to vector<8x40xf32>
    %89 = arith.subf %73, %88 : vector<8x40xf32>
    %cst_33 = arith.constant 9.99999974E-6 : f32
    %90 = vector.broadcast %cst_33 : f32 to vector<1x40xf32>
    %91 = arith.addf %87, %90 : vector<1x40xf32>
    %92 = math.rsqrt %91 : vector<1x40xf32>
    %93 = vector.broadcast %92 : vector<1x40xf32> to vector<8x40xf32>
    %94 = arith.mulf %89, %93 : vector<8x40xf32>
    %95 = vector.broadcast %74 : vector<1x40xf32> to vector<8x40xf32>
    %96 = arith.mulf %94, %95 : vector<8x40xf32>
    %97 = vector.broadcast %75 : vector<1x40xf32> to vector<8x40xf32>
    %98 = arith.addf %96, %97 : vector<8x40xf32>
    %cst_34 = arith.constant 0.000000e+00 : f32
    %99 = vector.broadcast %cst_34 : f32 to vector<8x40xf32>
    %100 = arith.cmpf oge, %98, %99 : vector<8x40xf32>
    %cst_35 = arith.constant 0.00999999977 : f32
    %101 = vector.broadcast %cst_35 : f32 to vector<8x40xf32>
    %102 = arith.mulf %98, %101 : vector<8x40xf32>
    %103 = arith.select %100, %98, %102 : vector<8x40xi1>, vector<8x40xf32>
    %c80 = arith.constant 80 : index
    %c0_36 = arith.constant 0 : index
    %104 = vector.load %arg5[%c80, %c0_36] : memref<120x128xbf16, #tpu.memory_space<vmem>>, vector<40x128xbf16>
    %105 = arith.extf %104 : vector<40x128xbf16> to vector<40x128xf32>
    %cst_37 = arith.constant dense<0.000000e+00> : vector<8x128xf32>
    %106 = tpu.matmul %103, %105, %cst_37 {dimension_numbers = #tpu.dot_dimension_numbers<[1], [0], [0], [1], [0, 0, 1, 1], [], []>} : vector<8x40xf32>, vector<40x128xf32>, vector<8x128xf32> -> vector<8x128xf32>
    %c6 = arith.constant 6 : index
    %c0_38 = arith.constant 0 : index
    %107 = vector.load %arg2[%c6, %c0_38] : memref<7x128xf32, #tpu.memory_space<vmem>>, vector<1x128xf32>
    %108 = vector.broadcast %107 : vector<1x128xf32> to vector<8x128xf32>
    %109 = arith.addf %106, %108 : vector<8x128xf32>
    %c0_39 = arith.constant 0 : index
    %c0_40 = arith.constant 0 : index
    %110 = vector.load %arg4[%c0_39, %c0_40] : memref<8x128xf32, #tpu.memory_space<vmem>>, vector<8x128xf32>
    tpu.vector_store %arg4[%c0_39, %c0_40], %109 {strides = array<i32>} : memref<8x128xf32, #tpu.memory_space<vmem>>, vector<8x128xf32>,
    return
  }
}

</mosaic_0001>

<bundles_post_ra>
// kernel: tpu_custom_call.1
= control target key start
LH: loop header
LB: loop body
LE: loop exit
PB: predicated region body
PF: predicated region fallthrough
CT: control target
= control target key end

     0   :  { %9 = vsyncpa [#allocation5], 0  ;;  %s1915_s0 = inlined_call_operand.vmem [shape: bf16[8,1024], index: 0, kind: input, shape index: {}]   ;;  %s1916_s1 = inlined_call_operand.vmem [shape: bf16[1024,40], index: 1, kind: input, shape index: {}]   ;;  %s1917_s2 = inlined_call_operand.vmem [shape: f32[7,128], index: 2, kind: input, shape index: {}]   ;;  %s1918_s3 = inlined_call_operand.vmem [shape: bf16[120,128], index: 3, kind: input, shape index: {}]   ;;  %s1919_s4 = inlined_call_operand.hbm [shape: f32[8,128], index: 4, kind: output, shape index: {}]  }
   0x1   :  { %v54_v0 = vld [vmem:[%s1918_s3] sm:$0xff]  ;;  %v56_v1 = vld [vmem:[%s1918_s3 + $0x8] sm:$0xff]  ;;  %v58_v2 = vld [vmem:[%s1918_s3 + $0x10] sm:$0xff] }
   0x2   :  { %55 = vst [vmem:[#allocation2] sm:$0xff] %v54_v0  ;;  %57 = vst [vmem:[#allocation2 + $0x8] sm:$0xff] %v56_v1  ;;  %v60_v3 = vld [vmem:[%s1918_s3 + $0x18] sm:$0xff]  ;;  %v62_v4 = vld [vmem:[%s1918_s3 + $0x20] sm:$0xff] }
   0x3   :  { %59 = vst [vmem:[#allocation2 + $0x10] sm:$0xff] %v58_v2  ;;  %61 = vst [vmem:[#allocation2 + $0x18] sm:$0xff] %v60_v3  ;;  %v64_v5 = vld [vmem:[%s1918_s3 + $0x28] sm:$0xff]  ;;  %v66_v6 = vld [vmem:[%s1918_s3 + $0x30] sm:$0xff] }
   0x4   :  { %63 = vst [vmem:[#allocation2 + $0x20] sm:$0xff] %v62_v4  ;;  %v1203_v7 = vld [vmem:[%s1918_s3 + $0x38] sm:$0xf]  ;;  %65 = vst [vmem:[#allocation2 + $0x28] sm:$0xff] %v64_v5 }
   0x5   :  { %67 = vst [vmem:[#allocation2 + $0x30] sm:$0xff] %v66_v6  ;;  %78 = vst [vmem:[#allocation2 + $0x38] sm:$0xf] %v1203_v7 }
   0x6   :  { %82 = vsyncadd [#allocation3], 960  ;;  %v1493_v8 = vld [vmem:[%s1916_s1 + $0x40] sm:$0xff]   ;;  %v1497_v12 = vld [vmem:[%s1916_s1 + $0x48] sm:$0xff]   ;;  %vm795_vm1 = vcmask 326656  }
   0x7   :  { %v1494_v9 = vld [vmem:[%s1916_s1 + $0xc0] sm:$0xff]   ;;  %1317 = vmatprep.subr.bf16.mxu0 %v1493_v8  ;;  %v1498_v13 = vld [vmem:[%s1916_s1 + $0xc8] sm:$0xff]   ;;  %v1501_v16 = vld [vmem:[%s1916_s1 + $0x50] sm:$0xff]  }
   0x8   :  { %v1495_v10 = vld [vmem:[%s1916_s1] sm:$0xff]   ;;  %1339 = vmatprep.subr.bf16.mxu1 %v1494_v9  ;;  %v1499_v14 = vld [vmem:[%s1916_s1 + $0x8] sm:$0xff]   ;;  %v1502_v17 = vld [vmem:[%s1916_s1 + $0xd0] sm:$0xff]  }
   0x9   :  { %v1496_v11 = vld [vmem:[%s1916_s1 + $0x80] sm:$0xff]   ;;  %1318 = vmatpush3.bf16.msra.mxu0 %v1495_v10  ;;  %v1500_v15 = vld [vmem:[%s1916_s1 + $0x88] sm:$0xff]   ;;  %v1503_v18 = vld [vmem:[%s1916_s1 + $0x10] sm:$0xff]  }
   0xa   :  { %1340 = vmatpush3.bf16.msra.mxu1 %v1496_v11  ;;  %1319 = vmatprep.subr.bf16.mxu0 %v1497_v12  ;;  %v1504_v19 = vld [vmem:[%s1916_s1 + $0x90] sm:$0xff]   ;;  %v1505_v20 = vld [vmem:[%s1916_s1 + $0x58] sm:$0xff]   ;;  %v1509_v24 = vld [vmem:[%s1916_s1 + $0x60] sm:$0xff]  }
   0xb   :  { %1341 = vmatprep.subr.bf16.mxu1 %v1498_v13  ;;  %v1506_v21 = vld [vmem:[%s1916_s1 + $0xd8] sm:$0xff]   ;;  %v1510_v25 = vld [vmem:[%s1916_s1 + $0xe0] sm:$0xff]   ;;  %v1513_v28 = vld [vmem:[%s1916_s1 + $0x68] sm:$0xff]  }
   0xc   :  { %v1507_v22 = vld [vmem:[%s1916_s1 + $0x18] sm:$0xff]   ;;  %v1511_v26 = vld [vmem:[%s1916_s1 + $0x20] sm:$0xff]   ;;  %v1514_v29 = vld [vmem:[%s1916_s1 + $0xe8] sm:$0xff]  }
   0xd   :  { %1320 = vmatpush3.bf16.msra.mxu0 %v1499_v14  ;;  %v1508_v23 = vld [vmem:[%s1916_s1 + $0x98] sm:$0xff]   ;;  %v1512_v27 = vld [vmem:[%s1916_s1 + $0xa0] sm:$0xff]   ;;  %v1515_v30 = vld [vmem:[%s1916_s1 + $0x28] sm:$0xff]  }
   0xe   :  { %1342 = vmatpush3.bf16.msra.mxu1 %v1500_v15  ;;  %1321 = vmatprep.subr.bf16.mxu0 %v1501_v16  ;;  %v1516_v31 = vld [vmem:[%s1916_s1 + $0xa8] sm:$0xff]   ;;  %v1517_v32 = vld [vmem:[%s1916_s1 + $0x70] sm:$0xff]   ;;  %v1521_v36 = vld [vmem:[%s1916_s1 + $0x78] sm:$0xff]  }
   0xf   :  { %1343 = vmatprep.subr.bf16.mxu1 %v1502_v17  ;;  %v1518_v33 = vld [vmem:[%s1916_s1 + $0xf0] sm:$0xff]   ;;  %v1522_v37 = vld [vmem:[%s1916_s1 + $0xf8] sm:$0xff]   ;;  %v88_v40 = vld [vmem:[%s1915_s0] sm:$0xff] }
  0x10   :  { %v1519_v34 = vld [vmem:[%s1916_s1 + $0x30] sm:$0xff]   ;;  %v1523_v38 = vld [vmem:[%s1916_s1 + $0x38] sm:$0xff]   ;;  %v89_v41 = vld [vmem:[%s1915_s0 + $0x8] sm:$0xff]  ;;  %v1205_v42 = vcombine.low %v88_v40, %v88_v40  ;;  %v1206_v43 = vcombine.high %v88_v40, %v88_v40 }
  0x11   :  { %1322 = vmatpush3.bf16.msra.mxu0 %v1503_v18  ;;  %v1520_v35 = vld [vmem:[%s1916_s1 + $0xb0] sm:$0xff]   ;;  %v1524_v39 = vld [vmem:[%s1916_s1 + $0xb8] sm:$0xff]   ;;  %v1207_v44 = vcombine.low %v89_v41, %v89_v41  ;;  %v1208_v45 = vcombine.high %v89_v41, %v89_v41  ;;  %v1529_v46 = vld [vmem:[%s1916_s1 + $0x140] sm:$0xff]  }
  0x12   :  { %1344 = vmatpush3.bf16.msra.mxu1 %v1504_v19  ;;  %1323 = vmatprep.subr.bf16.mxu0 %v1505_v20  ;;  %v1530_v47 = vld [vmem:[%s1916_s1 + $0x1c0] sm:$0xff]   ;;  %v1533_v50 = vld [vmem:[%s1916_s1 + $0x148] sm:$0xff]   ;;  %v1537_v54 = vld [vmem:[%s1916_s1 + $0x150] sm:$0xff]  }
  0x13   :  { %1345 = vmatprep.subr.bf16.mxu1 %v1506_v21  ;;  %664 = vmatprep.mubr.bf16.mxu0 %v1206_v43  ;;  %v1531_v48 = vld [vmem:[%s1916_s1 + $0x100] sm:$0xff]   ;;  %v1534_v51 = vld [vmem:[%s1916_s1 + $0x1c8] sm:$0xff]   ;;  %v1538_v55 = vld [vmem:[%s1916_s1 + $0x1d0] sm:$0xff]  }
  0x14   :  { %704 = vmatprep.mubr.bf16.mxu1 %v1208_v45  ;;  %v1532_v49 = vld [vmem:[%s1916_s1 + $0x180] sm:$0xff]   ;;  %v1535_v52 = vld [vmem:[%s1916_s1 + $0x108] sm:$0xff]   ;;  %v1539_v56 = vld [vmem:[%s1916_s1 + $0x110] sm:$0xff]  }
  0x15   :  { %1324 = vmatpush3.bf16.msra.mxu0 %v1507_v22  ;;  %v1536_v53 = vld [vmem:[%s1916_s1 + $0x188] sm:$0xff]   ;;  %v1540_v57 = vld [vmem:[%s1916_s1 + $0x190] sm:$0xff]   ;;  %v1541_v58 = vld [vmem:[%s1916_s1 + $0x158] sm:$0xff]  }
  0x16   :  { %1346 = vmatpush3.bf16.msra.mxu1 %v1508_v23  ;;  %1325 = vmatprep.subr.bf16.mxu0 %v1509_v24  ;;  %v1542_v59 = vld [vmem:[%s1916_s1 + $0x1d8] sm:$0xff]   ;;  %v1545_v62 = vld [vmem:[%s1916_s1 + $0x160] sm:$0xff]   ;;  %v1549_v2 = vld [vmem:[%s1916_s1 + $0x168] sm:$0xff]  }
  0x17   :  { %1347 = vmatprep.subr.bf16.mxu1 %v1510_v25  ;;  %v1543_v60 = vld [vmem:[%s1916_s1 + $0x118] sm:$0xff]   ;;  %v1546_v63 = vld [vmem:[%s1916_s1 + $0x1e0] sm:$0xff]   ;;  %v1550_v3 = vld [vmem:[%s1916_s1 + $0x1e8] sm:$0xff]  }
  0x18   :  { %v1544_v61 = vld [vmem:[%s1916_s1 + $0x198] sm:$0xff]   ;;  %v1547_v0 = vld [vmem:[%s1916_s1 + $0x120] sm:$0xff]   ;;  %v1551_v4 = vld [vmem:[%s1916_s1 + $0x128] sm:$0xff]  }
  0x19   :  { %1326 = vmatpush3.bf16.msra.mxu0 %v1511_v26  ;;  %v1548_v1 = vld [vmem:[%s1916_s1 + $0x1a0] sm:$0xff]   ;;  %v1552_v5 = vld [vmem:[%s1916_s1 + $0x1a8] sm:$0xff]   ;;  %v1553_v6 = vld [vmem:[%s1916_s1 + $0x170] sm:$0xff]  }
  0x1a   :  { %1348 = vmatpush3.bf16.msra.mxu1 %v1512_v27  ;;  %1327 = vmatprep.subr.bf16.mxu0 %v1513_v28  ;;  %v1554_v7 = vld [vmem:[%s1916_s1 + $0x1f0] sm:$0xff]   ;;  %v1557_v10 = vld [vmem:[%s1916_s1 + $0x178] sm:$0xff]  }
  0x1b   :  { %1349 = vmatprep.subr.bf16.mxu1 %v1514_v29  ;;  %v1555_v8 = vld [vmem:[%s1916_s1 + $0x130] sm:$0xff]   ;;  %v1558_v11 = vld [vmem:[%s1916_s1 + $0x1f8] sm:$0xff]  }
  0x1c   :  { %v1556_v9 = vld [vmem:[%s1916_s1 + $0x1b0] sm:$0xff]   ;;  %v1559_v12 = vld [vmem:[%s1916_s1 + $0x138] sm:$0xff]  }
  0x1d   :  { %1328 = vmatpush3.bf16.msra.mxu0 %v1515_v30  ;;  %v1560_v13 = vld [vmem:[%s1916_s1 + $0x1b8] sm:$0xff]   ;;  %v90_v14 = vld [vmem:[%s1915_s0 + $0x10] sm:$0xff] }
  0x1e   :  { %1350 = vmatpush3.bf16.msra.mxu1 %v1516_v31  ;;  %1329 = vmatprep.subr.bf16.mxu0 %v1517_v32  ;;  %v91_v15 = vld [vmem:[%s1915_s0 + $0x18] sm:$0xff]  ;;  %v1209_v16 = vcombine.low %v90_v14, %v90_v14  ;;  %v1210_v17 = vcombine.high %v90_v14, %v90_v14  ;;  %v83_v31 = vlaneseq }
  0x1f   :  { %1351 = vmatprep.subr.bf16.mxu1 %v1518_v33  ;;  %v1211_v18 = vcombine.low %v91_v15, %v91_v15  ;;  %v1212_v19 = vcombine.high %v91_v15, %v91_v15 }
  0x20   :  { %v84_v32 = vshrl.u32 %v83_v31, 7 }
  0x21   :  { %1330 = vmatpush3.bf16.msra.mxu0 %v1519_v34 }
  0x22   :  { %1352 = vmatpush3.bf16.msra.mxu1 %v1520_v35  ;;  %1331 = vmatprep.subr.bf16.mxu0 %v1521_v36  ;;  %vm85_vm0 = vcmp.lt.s32.totalorder %v84_v32, 2 }
  0x23   :  { %1353 = vmatprep.subr.bf16.mxu1 %v1522_v37 }
  0x25   :  { %1332 = vmatpush3.bf16.msra.mxu0 %v1523_v38 }
  0x26   :  { %1354 = vmatpush3.bf16.msra.mxu1 %v1524_v39  ;;  %1361 = vmatprep.subr.bf16.mxu0 %v1529_v46 }
  0x27   :  { %1383 = vmatprep.subr.bf16.mxu1 %v1530_v47 }
  0x28   :  { %665 = vmatmul.mubr.bf16.vlgmr.msra.gmra.mrb[0].mxu0 %v1205_v42 }
  0x29   :  { %705 = vmatmul.mubr.bf16.vlgmr.msra.gmra.mrb[0].mxu1 %v1207_v44  ;;  %1362 = vmatpush3.bf16.msra.mxu0 %v1531_v48  ;;  %v1598_v44 = vmov 0.0  }
  0x2a   :  { %1384 = vmatpush3.bf16.msra.mxu1 %v1532_v49  ;;  %1363 = vmatprep.subr.bf16.mxu0 %v1533_v50  ;;  %v1856_v45 = vsel %vm85_vm0, 1.0, %v1598_v44 }
  0x2b   :  { %1385 = vmatprep.subr.bf16.mxu1 %v1534_v51  ;;  %744 = vmatprep.mubr.bf16.mxu0 %v1210_v17 }
  0x2c   :  { %784 = vmatprep.mubr.bf16.mxu1 %v1212_v19 }
  0x2d   :  { %1364 = vmatpush3.bf16.msra.mxu0 %v1535_v52 }
  0x2e   :  { %1386 = vmatpush3.bf16.msra.mxu1 %v1536_v53  ;;  %1365 = vmatprep.subr.bf16.mxu0 %v1537_v54 }
  0x2f   :  { %1387 = vmatprep.subr.bf16.mxu1 %v1538_v55 }
  0x31   :  { %1366 = vmatpush3.bf16.msra.mxu0 %v1539_v56 }
  0x32   :  { %1388 = vmatpush3.bf16.msra.mxu1 %v1540_v57  ;;  %1367 = vmatprep.subr.bf16.mxu0 %v1541_v58 }
  0x33   :  { %1389 = vmatprep.subr.bf16.mxu1 %v1542_v59 }
  0x35   :  { %1368 = vmatpush3.bf16.msra.mxu0 %v1543_v60 }
  0x36   :  { %1390 = vmatpush3.bf16.msra.mxu1 %v1544_v61  ;;  %1369 = vmatprep.subr.bf16.mxu0 %v1545_v62 }
  0x37   :  { %1391 = vmatprep.subr.bf16.mxu1 %v1546_v63 }
  0x39   :  { %1370 = vmatpush3.bf16.msra.mxu0 %v1547_v0 }
  0x3a   :  { %1392 = vmatpush3.bf16.msra.mxu1 %v1548_v1  ;;  %1371 = vmatprep.subr.bf16.mxu0 %v1549_v2 }
  0x3b   :  { %1393 = vmatprep.subr.bf16.mxu1 %v1550_v3 }
  0x3d   :  { %1372 = vmatpush3.bf16.msra.mxu0 %v1551_v4 }
  0x3e   :  { %1394 = vmatpush3.bf16.msra.mxu1 %v1552_v5  ;;  %1373 = vmatprep.subr.bf16.mxu0 %v1553_v6  ;;  %v1277_v6 = vld [vmem:[%s1917_s2] ss:$0 sm:$0xff] }
  0x3f   :  { %1395 = vmatprep.subr.bf16.mxu1 %v1554_v7 }
  0x41   :  { %1374 = vmatpush3.bf16.msra.mxu0 %v1555_v8  ;;  %v1278_v8 = vld [vmem:[%s1917_s2 + $0x3] ss:$0 sm:$0xff] }
  0x42   :  { %1396 = vmatpush3.bf16.msra.mxu1 %v1556_v9  ;;  %1375 = vmatprep.subr.bf16.mxu0 %v1557_v10 }
  0x43   :  { %1397 = vmatprep.subr.bf16.mxu1 %v1558_v11 }
  0x45   :  { %1376 = vmatpush3.bf16.msra.mxu0 %v1559_v12 }
  0x46   :  { %1398 = vmatpush3.bf16.msra.mxu1 %v1560_v13 }
  0x48   :  { %745 = vmatmul.mubr.bf16.vlgmr.msra.gmra.mrb[4].mxu0 %v1209_v16 }
  0x49   :  { %785 = vmatmul.mubr.bf16.vlgmr.msra.gmra.mrb[4].mxu1 %v1211_v18 }
  0xfb   :  { %v1333_v20 = vpop.f32.mrb[0].mxu0 }
  0xfc   :  { %v1355_v21 = vpop.f32.mrb[0].mxu1  ;;  %v1334_v22 = vpop.f32.mrb[1].mxu0 }
  0xfd   :  { %v1335_v23 = vadd.f32 %v1334_v22, %v1333_v20  ;;  %v1356_v24 = vpop.f32.mrb[1].mxu1  ;;  %v1336_v25 = vpop.f32.mrb[2].mxu0 }
  0xfe   :  { %v1357_v26 = vadd.f32 %v1356_v24, %v1355_v21  ;;  %v1358_v27 = vpop.f32.mrb[2].mxu1  ;;  %v1337_v28 = vpop.f32.mrb[3].mxu0 }
  0xff   :  { %v1359_v29 = vpop.f32.mrb[3].mxu1 }
 0x100   :  { %v707_v30 = vadd.f32 %v1357_v26, %v1335_v23 }
 0x11b   :  { %v1377_v33 = vpop.f32.mrb[4].mxu0 }
 0x11c   :  { %v1399_v34 = vpop.f32.mrb[4].mxu1  ;;  %v1378_v35 = vpop.f32.mrb[5].mxu0 }
 0x11d   :  { %v1379_v36 = vadd.f32 %v1378_v35, %v1377_v33  ;;  %v1400_v37 = vpop.f32.mrb[5].mxu1  ;;  %v1380_v38 = vpop.f32.mrb[6].mxu0 }
 0x11e   :  { %v1401_v39 = vadd.f32 %v1400_v37, %v1399_v34  ;;  %v1402_v40 = vpop.f32.mrb[6].mxu1  ;;  %v1381_v41 = vpop.f32.mrb[7].mxu0 }
 0x11f   :  { %v747_v42 = vadd.f32 %v1379_v36, %v707_v30  ;;  %v1403_v43 = vpop.f32.mrb[7].mxu1 }
 0x121   :  { %v787_v46 = vadd.f32 %v1401_v39, %v747_v42 }
 0x123   :  { %v794_v47 = vmul.f32 %v1856_v45, %v787_v46 }
 0x125   :  { %v796_v48 = vsel %vm795_vm1, %v794_v47, 0.0  ;;  %v804_v49 = vmul.f32 %v794_v47, %v787_v46 }
 0x126   :  { %v797_v50 = vrot.slane %v796_v48, 4 }
 0x127   :  { %v805_v51 = vsel %vm795_vm1, %v804_v49, 0.0 }
 0x128   :  { %v798_v52 = vadd.f32 %v797_v50, %v796_v48  ;;  %v806_v53 = vrot.slane %v805_v51, 4 }
 0x12a   :  { %v799_v54 = vrot.slane %v798_v52, 2  ;;  %v807_v55 = vadd.f32 %v806_v53, %v805_v51 }
 0x12c   :  { %v800_v56 = vadd.f32 %v799_v54, %v798_v52  ;;  %v808_v57 = vrot.slane %v807_v55, 2 }
 0x12e   :  { %v801_v58 = vrot.slane %v800_v56, 1  ;;  %v809_v59 = vadd.f32 %v808_v57, %v807_v55 }
 0x130   :  { %v802_v60 = vadd.f32 %v801_v58, %v800_v56  ;;  %v810_v61 = vrot.slane %v809_v59, 1 }
 0x132   :  { %v803_v62 = vmul.f32 0.5, %v802_v60  ;;  %v811_v63 = vadd.f32 %v810_v61, %v809_v59 }
 0x134   :  { %v812_v0 = vmul.f32 0.5, %v811_v63  ;;  %v813_v1 = vmul.f32 %v803_v62, %v803_v62  ;;  %v815_v4 = vsub.f32 %v787_v46, %v803_v62 }
 0x136   :  { %v814_v2 = vsub.f32 %v812_v0, %v813_v1 }
 0x138   :  { %v816_v3 = vadd.f32 1e-05, %v814_v2 }
 0x13a   :  { %1565 = vrsqrt.f32 %v816_v3 }
 0x144   :  { %v1566_v5 = vpop.eup %1565 }
 0x145   :  { %v818_v7 = vmul.f32 %v1566_v5, %v815_v4 }
 0x147   :  { %v823_v9 = vmul.f32 %v1277_v6, %v818_v7 }
 0x149   :  { %v828_v10 = vadd.f32 %v1278_v8, %v823_v9 }
 0x14b   :  { %vm829_vm2 = vcmp.ge.f32.partialorder %v828_v10, 0.0  ;;  %v830_v11 = vmul.f32 0.01, %v828_v10 }
 0x14d   :  { %v831_v12 = vsel %vm829_vm2, %v828_v10, %v830_v11 }
 0x14e   :  { %1594 = dma.done.wait [#allocation3], 960 }
 0x14f   :  { %1595 = vsyncadd [#allocation3], 4294966336  ;;  %v1599_v13 = vmov 0.0|0.0   ;;  %vm1600_vm3 = vmmov 0   ;;  %v1289_v14 = vld [vmem:[#allocation2] sm:$0xff]   ;;  %v1312_v15 = vld [vmem:[#allocation2 + $0x8] sm:$0xff]  }
 0x150   :  { %1462 = vmatprep.subr.bf16.mxu0 %v1599_v13  ;;  %1433 = vmatprep.mubr.msk.f32.mxu0 %vm1600_vm3, %v1598_v44  ;;  %v840_v16 = vld [vmem:[#allocation2 + $0x10] ss:$40 sps:$4 sm:$0xff]   ;;  %v1487_v19 = vld [vmem:[#allocation2 + $0x1c] sm:$0xff]   ;;  %v1281_v51 = vld [vmem:[%s1917_s2 + $0x4] ss:$0 sm:$0xff]  ;;  %s1601_s17 = smov [#allocation4]  }
 0x151   :  { %1468 = vmatprep.subr.bf16.mxu1 %v1599_v13  ;;  %1446 = vmatprep.mubr.msk.f32.mxu1 %vm1600_vm3, %v1598_v44  ;;  %v845_v17 = vunpack.c.l.bf16 %v840_v16  ;;  %v1567_v18 = vld [vmem:[#allocation2 + $0x14] sm:$0xff]   ;;  %v1314_v20 = vld [vmem:[#allocation2 + $0x20] sm:$0xff]   ;;  %v1315_v56 = vld [vmem:[#allocation2 + $0x28] sm:$0xff]   ;;  %v1089_v58 = vunpack.c.h.bf16 %v840_v16  ;;  %s1175_s18 = sshll.u32 %s1601_s17, 4  ;;  %s1176_s18 = int_to_ptr.vmem [resolvable:$true] %s1175_s18 }
 0x152   :  { %1464 = vmatpush3.bf16.msra.mxu0 %v1289_v14  ;;  %1470 = vmatpush3.bf16.msra.mxu1 %v1567_v18  ;;  %v1303_v21 = vunpack.c.h.bf16 %v1314_v20  ;;  %v1280_v49 = vld [vmem:[%s1917_s2 + $0x1] ss:$0 sm:$0xff]  ;;  %v1316_v57 = vld [vmem:[#allocation2 + $0x30] sm:$0xff]   ;;  %v1283_v18 = vld [vmem:[%s1917_s2 + $0x2] ss:$0 sm:$0xff]  ;;  %s1572_s19 = scalar_lea.vmem %s1176_s18, 128  ;;  %p1577_p1 = scmp.lt.s32.totalorder %s1176_s18, %s1176_s18 }
 0x153   :  { %1465 = vmatprep.subr.bf16.mxu0 %v1599_v13  ;;  %1471 = vmatprep.subr.bf16.mxu1 %v1599_v13  ;;  %v1284_v20 = vld [vmem:[%s1917_s2 + $0x5] ss:$0 sm:$0xff]  ;;  %p1573_p0 = scmp.ne.s32.totalorder %s1176_s18, %s1572_s19  ;;  %p1578_p2 = scmp.lt.s32.totalorder %s1572_s19, %s1572_s19 }
 0x155   :  { %p1579_p3 = por %p1578_p2, %p1577_p1 }
 0x156   :  { %1467 = vmatpush3.bf16.msra.mxu0 %v1312_v15  ;;  %1473 = vmatpush3.bf16.msra.mxu1 %v1487_v19 }
 0x157   :  { %1431 = vmatprep.subr.mxu0 %v1598_v44  ;;  %1444 = vmatprep.subr.mxu1 %v1598_v44  ;;  %p1580_p4 = pnand %p1579_p3, %p1573_p0 }
 0x15a   :  { %1432 = vmatpush3.msra.mxu0 %v845_v17  ;;  %1445 = vmatpush3.msra.mxu1 %v1303_v21 }
 0x15b   :  { %1434 = vmatmul.mubr.msk.f32.vlgmr.msra.gmra.mrb[8].mxu0 %vm795_vm1, %v831_v12  ;;  %1474 = vmatprep.subr.bf16.mxu0 %v1599_v13 }
 0x15c   :  { %1459 = vmatprep.mubr.msk.f32.mxu0 %vm1600_vm3, %v1598_v44  ;;  %1476 = vmatpush3.bf16.msra.mxu0 %v1315_v56 }
 0x15d   :  { %1477 = vmatprep.subr.bf16.mxu0 %v1599_v13 }
 0x160   :  { %1479 = vmatpush3.bf16.msra.mxu0 %v1316_v57 }
 0x161   :  { %1457 = vmatprep.subr.mxu0 %v1598_v44 }
 0x164   :  { %1458 = vmatpush3.msra.mxu0 %v1089_v58 }
 0x22e   :  { %v915_v22 = vpop.f32.mrb[8].mxu0 }
 0x22f   :  { %v921_v23 = vmul.f32 %v1856_v45, %v915_v22  ;;  %v1435_v24 = vpop.f32.mrb[9].mxu0 }
 0x231   :  { %v922_v25 = vsel %vm795_vm1, %v921_v23, 0.0  ;;  %v930_v26 = vmul.f32 %v921_v23, %v915_v22 }
 0x232   :  { %v923_v27 = vrot.slane %v922_v25, 4 }
 0x233   :  { %v931_v28 = vsel %vm795_vm1, %v930_v26, 0.0 }
 0x234   :  { %v924_v29 = vadd.f32 %v923_v27, %v922_v25  ;;  %v932_v30 = vrot.slane %v931_v28, 4  ;;  %v1285_v25 = vld [vmem:[%s1917_s2 + $0x6] ss:$0 sm:$0xff] }
 0x236   :  { %v925_v31 = vrot.slane %v924_v29, 2  ;;  %v933_v32 = vadd.f32 %v932_v30, %v931_v28 }
 0x238   :  { %v926_v33 = vadd.f32 %v925_v31, %v924_v29  ;;  %v934_v34 = vrot.slane %v933_v32, 2 }
 0x23a   :  { %v927_v35 = vrot.slane %v926_v33, 1  ;;  %v935_v36 = vadd.f32 %v934_v34, %v933_v32 }
 0x23c   :  { %v928_v37 = vadd.f32 %v927_v35, %v926_v33  ;;  %v936_v38 = vrot.slane %v935_v36, 1 }
 0x23e   :  { %v929_v39 = vmul.f32 0.5, %v928_v37  ;;  %v937_v40 = vadd.f32 %v936_v38, %v935_v36 }
 0x240   :  { %v938_v41 = vmul.f32 0.5, %v937_v40  ;;  %v939_v42 = vmul.f32 %v929_v39, %v929_v39  ;;  %v941_v47 = vsub.f32 %v915_v22, %v929_v39 }
 0x242   :  { %v940_v43 = vsub.f32 %v938_v41, %v939_v42 }
 0x244   :  { %v942_v46 = vadd.f32 1e-05, %v940_v43 }
 0x246   :  { %1568 = vrsqrt.f32 %v942_v46 }
 0x250   :  { %v1569_v48 = vpop.eup %1568 }
 0x251   :  { %v944_v50 = vmul.f32 %v1569_v48, %v941_v47 }
 0x253   :  { %v949_v52 = vmul.f32 %v1280_v49, %v944_v50 }
 0x255   :  { %v954_v53 = vadd.f32 %v1281_v51, %v949_v52 }
 0x257   :  { %vm955_vm4 = vcmp.ge.f32.partialorder %v954_v53, 0.0  ;;  %v956_v54 = vmul.f32 0.01, %v954_v53 }
 0x259   :  { %v957_v55 = vsel %vm955_vm4, %v954_v53, %v956_v54 }
 0x25a   :  { %1447 = vmatmul.mubr.msk.f32.vlgmr.msra.gmra.mrb[8].mxu1 %vm795_vm1, %v957_v55 }
 0x32d   :  { %v1037_v59 = vpop.f32.mrb[8].mxu1 }
 0x32e   :  { %v1043_v60 = vmul.f32 %v1856_v45, %v1037_v59  ;;  %v1448_v61 = vpop.f32.mrb[9].mxu1 }
 0x330   :  { %v1044_v62 = vsel %vm795_vm1, %v1043_v60, 0.0  ;;  %v1052_v63 = vmul.f32 %v1043_v60, %v1037_v59 }
 0x331   :  { %v1045_v0 = vrot.slane %v1044_v62, 4 }
 0x332   :  { %v1053_v1 = vsel %vm795_vm1, %v1052_v63, 0.0 }
 0x333   :  { %v1046_v2 = vadd.f32 %v1045_v0, %v1044_v62  ;;  %v1054_v3 = vrot.slane %v1053_v1, 4 }
 0x335   :  { %v1047_v4 = vrot.slane %v1046_v2, 2  ;;  %v1055_v5 = vadd.f32 %v1054_v3, %v1053_v1 }
 0x337   :  { %v1048_v6 = vadd.f32 %v1047_v4, %v1046_v2  ;;  %v1056_v7 = vrot.slane %v1055_v5, 2 }
 0x339   :  { %v1049_v8 = vrot.slane %v1048_v6, 1  ;;  %v1057_v9 = vadd.f32 %v1056_v7, %v1055_v5 }
 0x33b   :  { %v1050_v44 = vadd.f32 %v1049_v8, %v1048_v6  ;;  %v1058_v10 = vrot.slane %v1057_v9, 1 }
 0x33d   :  { %v1051_v11 = vmul.f32 0.5, %v1050_v44  ;;  %v1059_v12 = vadd.f32 %v1058_v10, %v1057_v9 }
 0x33f   :  { %v1060_v45 = vmul.f32 0.5, %v1059_v12  ;;  %v1061_v13 = vmul.f32 %v1051_v11, %v1051_v11  ;;  %v1063_v16 = vsub.f32 %v1037_v59, %v1051_v11 }
 0x341   :  { %v1062_v14 = vsub.f32 %v1060_v45, %v1061_v13 }
 0x343   :  { %v1064_v15 = vadd.f32 1e-05, %v1062_v14 }
 0x345   :  { %1570 = vrsqrt.f32 %v1064_v15 }
 0x34f   :  { %v1571_v17 = vpop.eup %1570 }
 0x350   :  { %v1066_v19 = vmul.f32 %v1571_v17, %v1063_v16 }
 0x352   :  { %v1071_v21 = vmul.f32 %v1283_v18, %v1066_v19 }
 0x354   :  { %v1076_v22 = vadd.f32 %v1284_v20, %v1071_v21 }
 0x356   :  { %vm1077_vm5 = vcmp.ge.f32.partialorder %v1076_v22, 0.0  ;;  %v1078_v23 = vmul.f32 0.01, %v1076_v22 }
 0x358   :  { %v1079_v24 = vsel %vm1077_vm5, %v1076_v22, %v1078_v23 }
 0x359   :  { %1460 = vmatmul.mubr.msk.f32.vlgmr.msra.gmra.mrb[10].mxu0 %vm795_vm1, %v1079_v24 }
 0x42c   :  { %v1164_v26 = vpop.f32.mrb[10].mxu0 }
 0x42d   :  { %v1165_v27 = vadd.f32 %v1285_v25, %v1164_v26  ;;  %v1461_v28 = vpop.f32.mrb[11].mxu0 }
 0x42f   :  { %1168 = vst [vmem:[#allocation4] sm:$0xff] %v1165_v27 }
 0x430   :  { %1583 = shalt.err (!%p1580_p4)
}
 0x431   :  { %s1584_s22 = scalar_lea.hbm %s1919_s4, 128 }
 0x432   :  { %p1585_p5 = scmp.ne.s32.totalorder %s1919_s4, %s1584_s22  ;;  %p1588_p6 = scmp.lt.u32.totalorder %s1584_s22, %s1919_s4 }
 0x434   :  { %p1590_p7 = pnand %p1588_p6, %p1585_p5 }
 0x436   :  { %1593 = shalt.err (!%p1590_p7)
}
 0x437   :  { %1178 = dma.vmem_to_hbm [thread:$0]  %s1176_s18, 128, %s1919_s4, [#allocation5]  }
 0x438   :  { %1596 = dma.done.wait [#allocation5], 128  }
 0x439   :  { %1597 = vsyncadd [#allocation5], 4294967168 }
 0x43a   :  { %1182 = vsyncpa [#allocation5], 1 }
 0x43b   :  { %1183 = vsyncmov [#allocation3] }
 0x43e   :  { %s1184_s28 = vpop.sfrf %1183 }
 0x43f   :  { %p1287_p8 = scmp.ne.s32.totalorder %s1184_s28, 0 }
 0x441   :  { %1188 = shalt.err (%p1287_p8)  }

</bundles_post_ra>
